<compile_context>
chip_gen: v6e
topology: v6e:2x2x1
jax: 0.10.0
libtpu: 0.0.40
codegen_flags: <defaults>
</compile_context>

<pallas_src>
import jax
import jax.numpy as jnp
from jax.experimental import pallas as pl
from jax.experimental.pallas import tpu as pltpu


def _round_up(v: int, m: int) -> int:
    return ((v + m - 1) // m) * m


def _nnmodel_kernel(x_ref, w1_ref, b1_ref, w2_ref, b2_ref, o_ref):
    # embedding: [TB, n_input] @ [n_input, n_hidden] + b1  (f32 accumulate on MXU)
    h = jnp.dot(x_ref[...], w1_ref[...], preferred_element_type=jnp.float32)
    h = h + b1_ref[...]
    # sigmoid: exp on the EUP, approx reciprocal also lands on the EUP slot
    h = pl.reciprocal(1.0 + jnp.exp(-h), approx=True)
    # head: [TB, n_hidden] @ [n_hidden, 128] + b2  -> lane-dense output slab
    out = jnp.dot(h.astype(w2_ref.dtype), w2_ref[...],
                  preferred_element_type=jnp.float32)
    out = out + b2_ref[...]
    o_ref[...] = out.astype(o_ref.dtype)


def nnmodel_forward(x, w_emb, b_emb, w_lin, b_lin, *,
                    block_b: int = 512, use_bf16: bool = False):
    """Fused forward pass.

    x:     [B, n_input]        float32
    w_emb: [n_input, n_hidden] (already transposed vs. PyTorch [out, in])
    b_emb: [1, n_hidden]
    w_lin: [n_hidden, n_output]
    b_lin: [1, n_output]
    returns [B, n_output] float32
    """
    B, n_input = x.shape
    n_output = w_lin.shape[1]

    # --- lane-dense output: pad the head to a multiple of 128 lanes ---------
    n_out_pad = _round_up(max(n_output, 128), 128)
    w_lin_p = jnp.pad(w_lin, ((0, 0), (0, n_out_pad - n_output)))
    b_lin_p = jnp.pad(b_lin, ((0, 0), (0, n_out_pad - n_output)))

    # --- batch tiling (TB multiple of 8; pad B up to a multiple of TB) ------
    # TB=512 rows of f32: streamed x tile + output slab stay well under the
    # v7x 32 MiB scoped-VMEM default even double-buffered.
    TB = min(_round_up(block_b, 8), _round_up(B, 8))
    B_pad = _round_up(B, TB)
    if B_pad != B:
        x = jnp.pad(x, ((0, B_pad - B), (0, 0)))

    # --- optional bf16 MXU operands (halves DMA bytes; f32 accumulate) ------
    if use_bf16:
        x = x.astype(jnp.bfloat16)
        w_emb = w_emb.astype(jnp.bfloat16)
        w_lin_p = w_lin_p.astype(jnp.bfloat16)

    grid = (B_pad // TB,)

    # grid-invariant blocks -> weights/biases stay resident in VMEM
    resident = lambda a: pl.BlockSpec(a.shape, lambda i: (0,) * a.ndim)

    out_padded = pl.pallas_call(
        _nnmodel_kernel,
        out_shape=jax.ShapeDtypeStruct((B_pad, n_out_pad), jnp.float32),
        grid=grid,
        in_specs=[
            pl.BlockSpec((TB, n_input), lambda i: (i, 0)),   # streamed x tiles
            resident(w_emb),
            resident(b_emb),
            resident(w_lin_p),
            resident(b_lin_p),
        ],
        out_specs=pl.BlockSpec((TB, n_out_pad), lambda i: (i, 0)),
        compiler_params=pltpu.CompilerParams(
            dimension_semantics=("parallel",),   # shard batch across TCs (v7x)
        ),
    )(x, w_emb, b_emb, w_lin_p, b_lin_p)

    return out_padded[:B, :n_output]


def nnmodel_reference(x, w_emb, b_emb, w_lin, b_lin):
    h = x @ w_emb + b_emb
    h = jax.nn.sigmoid(h)
    return h @ w_lin + b_lin


if __name__ == "__main__":
    # Small shapes consistent with the module: n_input=32, n_hidden=10, n_output=2
    B, n_input, n_hidden, n_output = 8, 32, 10, 2

    key = jax.random.PRNGKey(0)
    k_x, k_w1, k_b1, k_w2, k_b2 = jax.random.split(key, 5)

    x = jax.random.normal(k_x, (B, n_input), dtype=jnp.float32)

    # Deterministic "init" of the synthetic parameters.
    w_emb = jax.random.normal(k_w1, (n_input, n_hidden), dtype=jnp.float32) * 0.1
    b_emb = jax.random.normal(k_b1, (1, n_hidden), dtype=jnp.float32) * 0.1
    w_lin = jax.random.normal(k_w2, (n_hidden, n_output), dtype=jnp.float32) * 0.1
    b_lin = jax.random.normal(k_b2, (1, n_output), dtype=jnp.float32) * 0.1

    ref = nnmodel_reference(x, w_emb, b_emb, w_lin, b_lin)

    # f32 path (approx EUP reciprocal -> slightly looser than exact f32)
    out = nnmodel_forward(x, w_emb, b_emb, w_lin, b_lin)
    out = jax.block_until_ready(out)
    assert out.shape == (B, n_output)
    assert jnp.allclose(out, ref, atol=2e-3, rtol=2e-3), "mismatch vs. reference (f32)"

    # Exercise the multi-tile batch grid + bf16 MXU-operand path.
    B2 = 256
    x2 = jax.random.normal(jax.random.PRNGKey(1), (B2, n_input), dtype=jnp.float32)
    ref2 = nnmodel_reference(x2, w_emb, b_emb, w_lin, b_lin)
    out2 = nnmodel_forward(x2, w_emb, b_emb, w_lin, b_lin,
                           block_b=128, use_bf16=True)
    out2 = jax.block_until_ready(out2)
    assert out2.shape == (B2, n_output)
    assert jnp.allclose(out2, ref2, atol=3e-2, rtol=3e-2), "mismatch vs. reference (bf16)"

    print("KERNEL_OK")
</pallas_src>

<mosaic_0001>
module attributes {stable_mosaic.version = 11 : i64} {
  func.func @_nnmodel_kernel(%arg0: i32, %arg1: memref<8x32xf32, #tpu.memory_space<vmem>>, %arg2: memref<32x10xf32, #tpu.memory_space<vmem>>, %arg3: memref<1x10xf32, #tpu.memory_space<vmem>>, %arg4: memref<10x128xf32, #tpu.memory_space<vmem>>, %arg5: memref<1x128xf32, #tpu.memory_space<vmem>>, %arg6: memref<8x128xf32, #tpu.memory_space<vmem>>) attributes {dimension_semantics = [#tpu.dimension_semantics<parallel>], iteration_bounds = array<i64: 1>, scalar_prefetch = 0 : i64, scratch_operands = 0 : i64, tpu.core_type = #tpu.core_type<tc>, window_params = [{transform_indices = @transform_0, window_bounds = array<i64: 8, 32>}, {pipeline_mode = #tpu.pipeline_mode<synchronous>, transform_indices = @transform_1, window_bounds = array<i64: 32, 10>}, {pipeline_mode = #tpu.pipeline_mode<synchronous>, transform_indices = @transform_2, window_bounds = array<i64: 1, 10>}, {pipeline_mode = #tpu.pipeline_mode<synchronous>, transform_indices = @transform_3, window_bounds = array<i64: 10, 128>}, {pipeline_mode = #tpu.pipeline_mode<synchronous>, transform_indices = @transform_4, window_bounds = array<i64: 1, 128>}, {transform_indices = @transform_5, window_bounds = array<i64: 8, 128>}]} {
    %c0 = arith.constant 0 : index
    %c0_0 = arith.constant 0 : index
    %0 = vector.load %arg1[%c0, %c0_0] : memref<8x32xf32, #tpu.memory_space<vmem>>, vector<8x32xf32>
    %c0_1 = arith.constant 0 : index
    %c0_2 = arith.constant 0 : index
    %1 = vector.load %arg2[%c0_1, %c0_2] : memref<32x10xf32, #tpu.memory_space<vmem>>, vector<32x10xf32>
    %cst = arith.constant dense<0.000000e+00> : vector<8x10xf32>
    %2 = tpu.matmul %0, %1, %cst {dimension_numbers = #tpu.dot_dimension_numbers<[1], [0], [0], [1], [0, 0, 1, 1], [], []>} : vector<8x32xf32>, vector<32x10xf32>, vector<8x10xf32> -> vector<8x10xf32>
    %c0_3 = arith.constant 0 : index
    %c0_4 = arith.constant 0 : index
    %3 = vector.load %arg3[%c0_3, %c0_4] : memref<1x10xf32, #tpu.memory_space<vmem>>, vector<1x10xf32>
    %4 = vector.broadcast %3 : vector<1x10xf32> to vector<8x10xf32>
    %5 = arith.addf %2, %4 : vector<8x10xf32>
    %cst_5 = arith.constant 0.000000e+00 : f32
    %6 = vector.broadcast %cst_5 : f32 to vector<8x10xf32>
    %7 = arith.subf %6, %5 : vector<8x10xf32>
    %8 = math.exp %7 : vector<8x10xf32>
    %cst_6 = arith.constant 1.000000e+00 : f32
    %9 = vector.broadcast %cst_6 : f32 to vector<8x10xf32>
    %10 = arith.addf %9, %8 : vector<8x10xf32>
    %11 = tpu.reciprocal %10 {approx = true} : vector<8x10xf32> -> vector<8x10xf32>
    %c0_7 = arith.constant 0 : index
    %c0_8 = arith.constant 0 : index
    %12 = vector.load %arg4[%c0_7, %c0_8] : memref<10x128xf32, #tpu.memory_space<vmem>>, vector<10x128xf32>
    %cst_9 = arith.constant dense<0.000000e+00> : vector<8x128xf32>
    %13 = tpu.matmul %11, %12, %cst_9 {dimension_numbers = #tpu.dot_dimension_numbers<[1], [0], [0], [1], [0, 0, 1, 1], [], []>} : vector<8x10xf32>, vector<10x128xf32>, vector<8x128xf32> -> vector<8x128xf32>
    %c0_10 = arith.constant 0 : index
    %c0_11 = arith.constant 0 : index
    %14 = vector.load %arg5[%c0_10, %c0_11] : memref<1x128xf32, #tpu.memory_space<vmem>>, vector<1x128xf32>
    %15 = vector.broadcast %14 : vector<1x128xf32> to vector<8x128xf32>
    %16 = arith.addf %13, %15 : vector<8x128xf32>
    %c0_12 = arith.constant 0 : index
    %c0_13 = arith.constant 0 : index
    %17 = vector.load %arg6[%c0_12, %c0_13] : memref<8x128xf32, #tpu.memory_space<vmem>>, vector<8x128xf32>
    tpu.vector_store %arg6[%c0_12, %c0_13], %16 {strides = array<i32>} : memref<8x128xf32, #tpu.memory_space<vmem>>, vector<8x128xf32>,
    return
  }
  func.func @transform_0(%arg0: i32) -> (i32, i32) {
    %c0_i32 = arith.constant 0 : i32
    %c0_i32_0 = arith.constant 0 : i32
    return %arg0, %c0_i32 : i32, i32
  }
  func.func @transform_1(%arg0: i32) -> (i32, i32) {
    %c0_i32 = arith.constant 0 : i32
    %c0_i32_0 = arith.constant 0 : i32
    %c0_i32_1 = arith.constant 0 : i32
    return %c0_i32, %c0_i32_0 : i32, i32
  }
  func.func @transform_2(%arg0: i32) -> (i32, i32) {
    %c0_i32 = arith.constant 0 : i32
    %c0_i32_0 = arith.constant 0 : i32
    %c0_i32_1 = arith.constant 0 : i32
    return %c0_i32, %c0_i32_0 : i32, i32
  }
  func.func @transform_3(%arg0: i32) -> (i32, i32) {
    %c0_i32 = arith.constant 0 : i32
    %c0_i32_0 = arith.constant 0 : i32
    %c0_i32_1 = arith.constant 0 : i32
    return %c0_i32, %c0_i32_0 : i32, i32
  }
  func.func @transform_4(%arg0: i32) -> (i32, i32) {
    %c0_i32 = arith.constant 0 : i32
    %c0_i32_0 = arith.constant 0 : i32
    %c0_i32_1 = arith.constant 0 : i32
    return %c0_i32, %c0_i32_0 : i32, i32
  }
  func.func @transform_5(%arg0: i32) -> (i32, i32) {
    %c0_i32 = arith.constant 0 : i32
    %c0_i32_0 = arith.constant 0 : i32
    return %arg0, %c0_i32 : i32, i32
  }
}

</mosaic_0001>

<bundles_post_ra>
// kernel: tpu_custom_call.1
= control target key start
LH: loop header
LB: loop body
LE: loop exit
PB: predicated region body
PF: predicated region fallthrough
CT: control target
= control target key end

     0   :  { %v274_v1 = vmov 0.0   ;;  %vm275_vm0 = vmmov 0   ;;  %s337_s0 = inlined_call_operand.vmem [shape: f32[8,32], index: 0, kind: input, shape index: {}]   ;;  %s338_s1 = inlined_call_operand.vmem [shape: f32[32,10], index: 1, kind: input, shape index: {}]   ;;  %s339_s2 = inlined_call_operand.vmem [shape: f32[1,10], index: 2, kind: input, shape index: {}]   ;;  %s340_s3 = inlined_call_operand.vmem [shape: f32[10,128], index: 3, kind: input, shape index: {}]   ;;  %s341_s4 = inlined_call_operand.vmem [shape: f32[1,128], index: 4, kind: input, shape index: {}]   ;;  %s342_s5 = inlined_call_operand.hbm [shape: f32[8,128], index: 5, kind: output, shape index: {}]  }
   0x1   :  { %v25_v0 = vld [vmem:[%s338_s1 + $0x18] sm:$0xff]  ;;  %227 = vmatprep.subr.mxu0 %v274_v1  ;;  %v24_v2 = vld [vmem:[%s338_s1 + $0x10] sm:$0xff]  ;;  %235 = vmatprep.mubr.msk.f32.mxu0 %vm275_vm0, %v274_v1 }
   0x2   :  { %228 = vmatpush3.msra.mxu0 %v25_v0  ;;  %238 = vmatprep.subr.mxu1 %v274_v1 }
   0x3   :  { %10 = vsyncpa [#allocation3], 0  ;;  %229 = vmatprep.subr.mxu0 %v274_v1  ;;  %v23_v3 = vld [vmem:[%s338_s1 + $0x8] sm:$0xff]  ;;  %242 = vmatprep.mubr.msk.f32.mxu1 %vm275_vm0, %v274_v1  ;;  %v22_v4 = vld [vmem:[%s338_s1] sm:$0xff]  ;;  %vm33_vm1 = vcmask 261120   ;;  %vm125_vm2 = vcmask 1041408  }
   0x4   :  { %230 = vmatpush3.msra.mxu0 %v24_v2  ;;  %v21_v5 = vld [vmem:[%s337_s0] sm:$0xff]  ;;  %v113_v6 = vld [vmem:[%s340_s3 + $0x8] sm:$0x3]  ;;  %vm121_vm3 = vcmask 80896   ;;  %s276_s8 = smov [#allocation2]  }
   0x5   :  { %231 = vmatprep.subr.mxu0 %v274_v1  ;;  %v112_v7 = vld [vmem:[%s340_s3] sm:$0xff]  ;;  %239 = vmatpush3.msk.msra.mxu1 %vm125_vm2, %v113_v6  ;;  %s206_s9 = sshll.u32 %s276_s8, 4  ;;  %s207_s9 = int_to_ptr.vmem [resolvable:$true] %s206_s9 }
   0x6   :  { %232 = vmatpush3.msra.mxu0 %v23_v3  ;;  %240 = vmatprep.subr.mxu1 %v274_v1  ;;  %v214_v8 = vld [vmem:[%s339_s2] ss:$0 sm:$0xff]  ;;  %s252_s2 = scalar_lea.vmem %s207_s9, 128  ;;  %p257_p1 = scmp.lt.s32.totalorder %s207_s9, %s207_s9 }
   0x7   :  { %233 = vmatprep.subr.mxu0 %v274_v1  ;;  %241 = vmatpush3.msra.mxu1 %v112_v7  ;;  %v216_v17 = vld [vmem:[%s341_s4] ss:$0 sm:$0xff]  ;;  %p253_p0 = scmp.ne.s32.totalorder %s207_s9, %s252_s2  ;;  %p258_p2 = scmp.lt.s32.totalorder %s252_s2, %s252_s2 }
   0x8   :  { %234 = vmatpush3.msra.mxu0 %v22_v4 }
   0x9   :  { %236 = vmatmul.mubr.msk.f32.vlgmr.msra.gmra.mxu0 %vm33_vm1, %v21_v5  ;;  %p259_p3 = por %p258_p2, %p257_p1 }
   0xb   :  { %p260_p4 = pnand %p259_p3, %p253_p0 }
  0xc9   :  { %v103_v9 = vpop.f32.mrf.mxu0 }
  0xca   :  { %v104_v10 = vadd.f32 %v214_v8, %v103_v9 }
  0xcb   :  { %v237_v11 = vpop.f32.mrf.mxu0 }
  0xcc   :  { %v107_v12 = vsub.f32 0.0, %v104_v10 }
  0xce   :  { %v108_v13 = vmul.f32 1.442695, %v107_v12 }
  0xd0   :  { %248 = vpow2.f32 %v108_v13 }
  0xdd   :  { %v249_v14 = vpop.eup %248 }
  0xde   :  { %v110_v15 = vadd.f32 1.0, %v249_v14 }
  0xe0   :  { %250 = vrcp.f32 %v110_v15 }
  0xed   :  { %v251_v16 = vpop.eup %250 }
  0xee   :  { %243 = vmatmul.mubr.msk.f32.vlgmr.msra.gmra.mxu1 %vm121_vm3, %v251_v16 }
 0x1ae   :  { %v195_v18 = vpop.f32.mrf.mxu1 }
 0x1af   :  { %v196_v19 = vadd.f32 %v216_v17, %v195_v18 }
 0x1b0   :  { %v244_v20 = vpop.f32.mrf.mxu1 }
 0x1b1   :  { %199 = vst [vmem:[#allocation2] sm:$0xff] %v196_v19 }
 0x1b2   :  { %263 = shalt.err (!%p260_p4)
}
 0x1b3   :  { %209 = dma.vmem_to_hbm [thread:$0]  %s207_s9, 128, %s342_s5, [#allocation3]  }
 0x1b4   :  { %272 = dma.done.wait [#allocation3], 128  }
 0x1b5   :  { %273 = vsyncadd [#allocation3], 4294967168 }
 0x1b6   :  { %213 = vsyncpa [#allocation3], 1 }

</bundles_post_ra>
